<compile_context>
chip_gen: v7x
topology: tpu7x:2x2x1
jax: 0.10.0
libtpu: 0.0.40
codegen_flags: <defaults>
</compile_context>

<pallas_src>
import jax
import jax.numpy as jnp
from jax.experimental import pallas as pl
from jax.experimental.pallas import tpu as pltpu


# --------------------------------------------------------------------------- #
# Generation-aware sizing helpers
# --------------------------------------------------------------------------- #
def _vmem_capacity_bytes():
    try:
        return int(pltpu.get_tpu_info().vmem_capacity_bytes)
    except Exception:
        return 64 * 1024 * 1024  # conservative default (v7x per-TensorCore VMEM)


def _choose_tl(N, C_in, C_out, L):
    """Lane-tile length along L: big enough to hit the HBM roofline, small enough
    to fit the double-buffered working set in VMEM and keep >=~4 grid steps."""
    if L <= 128:
        return L  # full extent (block dim == array dim is always legal)
    per_col = (C_in + 2 * C_out) * 4          # f32 bytes: one x column + its output pair
    budget = min((_vmem_capacity_bytes() * 2) // 5, 48 << 20)  # ~40% of VMEM, abs cap
    tl = budget // (2 * per_col)              # 2x: double-buffered in/out blocks
    # Keep at least ~4 grid steps so both v7x TensorCores and the DMA pipeline stay busy,
    # but never shrink below 512 columns (tiny tiles are per-step-overhead bound).
    ltiles_wanted = max(1, -(-4 // N))
    tl = min(tl, max(512, -(-L // ltiles_wanted)))
    tl = min(tl, L)
    tl = max(128, (tl // 128) * 128)
    return tl


def _compiler_params():
    cap = _vmem_capacity_bytes()
    return pltpu.CompilerParams(
        dimension_semantics=("parallel", "parallel"),
        # Raise the scoped VMEM limit (v5e default is 16 MiB); stay well under physical.
        vmem_limit_bytes=min(cap * 3 // 4, 100 << 20),
    )


# --------------------------------------------------------------------------- #
# Primary path: tap interleave fused into the kernel (single HBM pass)
# --------------------------------------------------------------------------- #
def _fused_kernel(x_ref, w_ref, b_ref, o_ref):
    # x_ref: (C_in, TL)        native-layout tile, batch dim squeezed, L on lanes
    # w_ref: (K=2, C_out, C_in) per-tap weights, resident in VMEM across the grid
    # b_ref: (C_out, 1)        bias column, broadcast along lanes
    # o_ref: (C_out, 2*TL)     final interleaved output tile (lane-dense)
    x = x_ref[...]
    y0 = jnp.dot(w_ref[0], x, preferred_element_type=jnp.float32)  # tap k=0, (C_out, TL)
    y1 = jnp.dot(w_ref[1], x, preferred_element_type=jnp.float32)  # tap k=1, (C_out, TL)
    c_out, tl = y0.shape
    # out[:, 2t + k] = y_k[:, t]  -- minor-axis interleave, rides the idle XLU slot.
    o_ref[...] = jnp.stack([y0, y1], axis=-1).reshape(c_out, 2 * tl) + b_ref[...]


def _upsample_fused(x, weight, bias, TL):
    N, C_in, L = x.shape
    _, C_out, K = weight.shape
    num_l = pl.cdiv(L, TL)

    # (C_in, C_out, K) -> (K, C_out, C_in): w_koc[k] is the (C_out, C_in) matrix for tap k.
    w_koc = jnp.transpose(weight, (2, 1, 0))
    b_col = bias.reshape(C_out, 1)

    cost = pl.CostEstimate(
        flops=2 * N * L * C_in * (K * C_out),
        transcendentals=0,
        bytes_accessed=4 * (N * C_in * L + K * C_out * C_in + C_out + N * C_out * K * L),
    )

    return pl.pallas_call(
        _fused_kernel,
        out_shape=jax.ShapeDtypeStruct((N, C_out, K * L), jnp.float32),
        grid=(N, num_l),
        in_specs=[
            # x: (N, C_in, L), block (1[squeezed], C_in, TL)
            pl.BlockSpec((None, C_in, TL), lambda n, l: (n, 0, l)),
            # weights / bias: full arrays, resident in VMEM for the whole grid
            pl.BlockSpec((K, C_out, C_in), lambda n, l: (0, 0, 0)),
            pl.BlockSpec((C_out, 1), lambda n, l: (0, 0)),
        ],
        out_specs=pl.BlockSpec((None, C_out, K * TL), lambda n, l: (n, 0, l)),
        compiler_params=_compiler_params(),
        cost_estimate=cost,
    )(x, w_koc, b_col)


# --------------------------------------------------------------------------- #
# Fallback path (previous, proven kernel): split taps + wrapper interleave.
# Only used if the fused kernel's minor-dim interleave reshape fails to lower
# on the local Mosaic version.
# --------------------------------------------------------------------------- #
def _split_kernel(x_ref, w_ref, b_ref, o_ref):
    o_ref[...] = (
        jnp.dot(w_ref[...], x_ref[...], preferred_element_type=jnp.float32)
        + b_ref[...]
    )


def _upsample_split(x, weight, bias, TL):
    N, C_in, L = x.shape
    _, C_out, K = weight.shape
    CK = C_out * K
    num_l = pl.cdiv(L, TL)

    w_t = jnp.transpose(weight.reshape(C_in, CK))  # (CK, C_in), row co*K + k
    b_col = jnp.repeat(bias, K).reshape(CK, 1)

    cost = pl.CostEstimate(
        flops=2 * N * L * C_in * CK,
        transcendentals=0,
        bytes_accessed=4 * (N * C_in * L + CK * C_in + CK + N * CK * L),
    )

    y = pl.pallas_call(
        _split_kernel,
        out_shape=jax.ShapeDtypeStruct((N, CK, L), jnp.float32),
        grid=(N, num_l),
        in_specs=[
            pl.BlockSpec((None, C_in, TL), lambda n, l: (n, 0, l)),
            pl.BlockSpec((CK, C_in), lambda n, l: (0, 0)),
            pl.BlockSpec((CK, 1), lambda n, l: (0, 0)),
        ],
        out_specs=pl.BlockSpec((None, CK, TL), lambda n, l: (n, 0, l)),
        compiler_params=_compiler_params(),
        cost_estimate=cost,
    )(x, w_t, b_col)
    # Extra HBM pass only on the fallback path.
    return jnp.transpose(y.reshape(N, C_out, K, L), (0, 1, 3, 2)).reshape(N, C_out, K * L)


# --------------------------------------------------------------------------- #
# Public wrapper
# --------------------------------------------------------------------------- #
def upsample_conv_transpose1d(x, weight, bias):
    """ConvTranspose1d(C_in, C_in//2, kernel_size=2, stride=2) forward.

    Args:
      x:      (N, C_in, L)     float32, NCL (PyTorch layout)
      weight: (C_in, C_out, K) float32 (PyTorch ConvTranspose1d weight layout), K == 2
      bias:   (C_out,)         float32
    Returns:
      (N, C_out, 2*L) float32
    """
    N, C_in, L = x.shape
    _, C_out, K = weight.shape
    assert K == 2 and C_out == C_in // 2
    TL = _choose_tl(N, C_in, C_out, L)
    try:
        # Preferred: single-pass kernel with in-kernel tap interleave.
        return _upsample_fused(x, weight, bias, TL)
    except Exception:
        # Fallback if the minor-dim interleave reshape is not supported by the
        # installed Mosaic lowering (correctness-identical, one extra HBM pass).
        return _upsample_split(x, weight, bias, TL)


if __name__ == "__main__":
    key = jax.random.PRNGKey(0)
    N, C_in, L = 2, 8, 16
    C_out, K = C_in // 2, 2

    kx, kw, kb = jax.random.split(key, 3)
    x = jax.random.normal(kx, (N, C_in, L), dtype=jnp.float32)
    # Deterministic parameter init matching nn.ConvTranspose1d(C_in, C_in//2, 2, 2) shapes
    bound = 1.0 / (C_in * K) ** 0.5
    weight = jax.random.uniform(
        kw, (C_in, C_out, K), dtype=jnp.float32, minval=-bound, maxval=bound
    )
    bias = jax.random.uniform(
        kb, (C_out,), dtype=jnp.float32, minval=-bound, maxval=bound
    )

    out = jax.block_until_ready(upsample_conv_transpose1d(x, weight, bias))

    # Pure-JAX reference of ConvTranspose1d(k=2, s=2) semantics:
    # ref[n, co, 2l + k] = sum_ci x[n, ci, l] * W[ci, co, k] + b[co]
    ref = jnp.einsum("ncl,cok->nolk", x, weight).reshape(N, C_out, 2 * L) + bias[
        None, :, None
    ]
    assert out.shape == (N, C_out, 2 * L)
    assert jnp.allclose(out, ref, atol=1e-5, rtol=1e-5)

    print("KERNEL_OK")
</pallas_src>

<mosaic_0001>
module attributes {stable_mosaic.version = 11 : i64} {
  func.func @_fused_kernel(%arg0: i32, %arg1: i32, %arg2: memref<1x8x16xf32, #tpu.memory_space<vmem>>, %arg3: memref<2x4x8xf32, #tpu.memory_space<vmem>>, %arg4: memref<4x1xf32, #tpu.memory_space<vmem>>, %arg5: memref<1x4x32xf32, #tpu.memory_space<vmem>>) attributes {dimension_semantics = [#tpu.dimension_semantics<parallel>, #tpu.dimension_semantics<parallel>], iteration_bounds = array<i64: 2, 1>, scalar_prefetch = 0 : i64, scratch_operands = 0 : i64, tpu.core_type = #tpu.core_type<tc>, window_params = [{transform_indices = @transform_0, window_bounds = array<i64: 1, 8, 16>}, {pipeline_mode = #tpu.pipeline_mode<synchronous>, transform_indices = @transform_1, window_bounds = array<i64: 2, 4, 8>}, {pipeline_mode = #tpu.pipeline_mode<synchronous>, transform_indices = @transform_2, window_bounds = array<i64: 4, 1>}, {transform_indices = @transform_3, window_bounds = array<i64: 1, 4, 32>}]} {
    %c0 = arith.constant 0 : index
    %c0_0 = arith.constant 0 : index
    %c0_1 = arith.constant 0 : index
    %0 = vector.load %arg2[%c0, %c0_0, %c0_1] : memref<1x8x16xf32, #tpu.memory_space<vmem>>, vector<1x8x16xf32>
    %1 = vector.shape_cast %0 : vector<1x8x16xf32> to vector<8x16xf32>
    %c0_2 = arith.constant 0 : index
    %c0_3 = arith.constant 0 : index
    %c0_4 = arith.constant 0 : index
    %2 = vector.load %arg3[%c0_2, %c0_3, %c0_4] : memref<2x4x8xf32, #tpu.memory_space<vmem>>, vector<1x4x8xf32>
    %3 = vector.shape_cast %2 : vector<1x4x8xf32> to vector<4x8xf32>
    %cst = arith.constant dense<0.000000e+00> : vector<4x16xf32>
    %4 = tpu.matmul %3, %1, %cst {dimension_numbers = #tpu.dot_dimension_numbers<[1], [0], [0], [1], [0, 0, 1, 1], [], []>} : vector<4x8xf32>, vector<8x16xf32>, vector<4x16xf32> -> vector<4x16xf32>
    %c1 = arith.constant 1 : index
    %c0_5 = arith.constant 0 : index
    %c0_6 = arith.constant 0 : index
    %5 = vector.load %arg3[%c1, %c0_5, %c0_6] : memref<2x4x8xf32, #tpu.memory_space<vmem>>, vector<1x4x8xf32>
    %6 = vector.shape_cast %5 : vector<1x4x8xf32> to vector<4x8xf32>
    %cst_7 = arith.constant dense<0.000000e+00> : vector<4x16xf32>
    %7 = tpu.matmul %6, %1, %cst_7 {dimension_numbers = #tpu.dot_dimension_numbers<[1], [0], [0], [1], [0, 0, 1, 1], [], []>} : vector<4x8xf32>, vector<8x16xf32>, vector<4x16xf32> -> vector<4x16xf32>
    %8 = vector.shape_cast %4 : vector<4x16xf32> to vector<4x16x1xf32>
    %9 = vector.shape_cast %7 : vector<4x16xf32> to vector<4x16x1xf32>
    %10 = tpu.concatenate %8, %9 in 2 : vector<4x16x1xf32>, vector<4x16x1xf32> -> vector<4x16x2xf32>
    %11 = vector.shape_cast %10 : vector<4x16x2xf32> to vector<4x32xf32>
    %c0_8 = arith.constant 0 : index
    %c0_9 = arith.constant 0 : index
    %12 = vector.load %arg4[%c0_8, %c0_9] : memref<4x1xf32, #tpu.memory_space<vmem>>, vector<4x1xf32>
    %13 = vector.broadcast %12 : vector<4x1xf32> to vector<4x32xf32>
    %14 = arith.addf %11, %13 : vector<4x32xf32>
    %c0_10 = arith.constant 0 : index
    %c0_11 = arith.constant 0 : index
    %c0_12 = arith.constant 0 : index
    %15 = vector.load %arg5[%c0_10, %c0_11, %c0_12] : memref<1x4x32xf32, #tpu.memory_space<vmem>>, vector<1x4x32xf32>
    %16 = vector.shape_cast %15 : vector<1x4x32xf32> to vector<4x32xf32>
    %17 = vector.shape_cast %14 : vector<4x32xf32> to vector<1x4x32xf32>
    tpu.vector_store %arg5[%c0_10, %c0_11, %c0_12], %17 {strides = array<i32>} : memref<1x4x32xf32, #tpu.memory_space<vmem>>, vector<1x4x32xf32>,
    return
  }
  func.func @transform_0(%arg0: i32, %arg1: i32) -> (i32, i32, i32) {
    %c0_i32 = arith.constant 0 : i32
    %c0_i32_0 = arith.constant 0 : i32
    return %arg0, %c0_i32, %arg1 : i32, i32, i32
  }
  func.func @transform_1(%arg0: i32, %arg1: i32) -> (i32, i32, i32) {
    %c0_i32 = arith.constant 0 : i32
    %c0_i32_0 = arith.constant 0 : i32
    %c0_i32_1 = arith.constant 0 : i32
    %c0_i32_2 = arith.constant 0 : i32
    return %c0_i32, %c0_i32_0, %c0_i32_1 : i32, i32, i32
  }
  func.func @transform_2(%arg0: i32, %arg1: i32) -> (i32, i32) {
    %c0_i32 = arith.constant 0 : i32
    %c0_i32_0 = arith.constant 0 : i32
    %c0_i32_1 = arith.constant 0 : i32
    return %c0_i32, %c0_i32_0 : i32, i32
  }
  func.func @transform_3(%arg0: i32, %arg1: i32) -> (i32, i32, i32) {
    %c0_i32 = arith.constant 0 : i32
    %c0_i32_0 = arith.constant 0 : i32
    return %arg0, %c0_i32, %arg1 : i32, i32, i32
  }
}

module attributes {stable_mosaic.version = 11 : i64} {
  func.func @_split_kernel(%arg0: i32, %arg1: i32, %arg2: memref<1x8x16xf32, #tpu.memory_space<vmem>>, %arg3: memref<8x8xf32, #tpu.memory_space<vmem>>, %arg4: memref<8x1xf32, #tpu.memory_space<vmem>>, %arg5: memref<1x8x16xf32, #tpu.memory_space<vmem>>) attributes {dimension_semantics = [#tpu.dimension_semantics<parallel>, #tpu.dimension_semantics<parallel>], iteration_bounds = array<i64: 2, 1>, scalar_prefetch = 0 : i64, scratch_operands = 0 : i64, tpu.core_type = #tpu.core_type<tc>, window_params = [{transform_indices = @transform_0, window_bounds = array<i64: 1, 8, 16>}, {pipeline_mode = #tpu.pipeline_mode<synchronous>, transform_indices = @transform_1, window_bounds = array<i64: 8, 8>}, {pipeline_mode = #tpu.pipeline_mode<synchronous>, transform_indices = @transform_2, window_bounds = array<i64: 8, 1>}, {transform_indices = @transform_3, window_bounds = array<i64: 1, 8, 16>}]} {
    %c0 = arith.constant 0 : index
    %c0_0 = arith.constant 0 : index
    %0 = vector.load %arg3[%c0, %c0_0] : memref<8x8xf32, #tpu.memory_space<vmem>>, vector<8x8xf32>
    %c0_1 = arith.constant 0 : index
    %c0_2 = arith.constant 0 : index
    %c0_3 = arith.constant 0 : index
    %1 = vector.load %arg2[%c0_1, %c0_2, %c0_3] : memref<1x8x16xf32, #tpu.memory_space<vmem>>, vector<1x8x16xf32>
    %2 = vector.shape_cast %1 : vector<1x8x16xf32> to vector<8x16xf32>
    %cst = arith.constant dense<0.000000e+00> : vector<8x16xf32>
    %3 = tpu.matmul %0, %2, %cst {dimension_numbers = #tpu.dot_dimension_numbers<[1], [0], [0], [1], [0, 0, 1, 1], [], []>} : vector<8x8xf32>, vector<8x16xf32>, vector<8x16xf32> -> vector<8x16xf32>
    %c0_4 = arith.constant 0 : index
    %c0_5 = arith.constant 0 : index
    %4 = vector.load %arg4[%c0_4, %c0_5] : memref<8x1xf32, #tpu.memory_space<vmem>>, vector<8x1xf32>
    %5 = vector.broadcast %4 : vector<8x1xf32> to vector<8x16xf32>
    %6 = arith.addf %3, %5 : vector<8x16xf32>
    %c0_6 = arith.constant 0 : index
    %c0_7 = arith.constant 0 : index
    %c0_8 = arith.constant 0 : index
    %7 = vector.load %arg5[%c0_6, %c0_7, %c0_8] : memref<1x8x16xf32, #tpu.memory_space<vmem>>, vector<1x8x16xf32>
    %8 = vector.shape_cast %7 : vector<1x8x16xf32> to vector<8x16xf32>
    %9 = vector.shape_cast %6 : vector<8x16xf32> to vector<1x8x16xf32>
    tpu.vector_store %arg5[%c0_6, %c0_7, %c0_8], %9 {strides = array<i32>} : memref<1x8x16xf32, #tpu.memory_space<vmem>>, vector<1x8x16xf32>,
    return
  }
  func.func @transform_0(%arg0: i32, %arg1: i32) -> (i32, i32, i32) {
    %c0_i32 = arith.constant 0 : i32
    %c0_i32_0 = arith.constant 0 : i32
    return %arg0, %c0_i32, %arg1 : i32, i32, i32
  }
  func.func @transform_1(%arg0: i32, %arg1: i32) -> (i32, i32) {
    %c0_i32 = arith.constant 0 : i32
    %c0_i32_0 = arith.constant 0 : i32
    %c0_i32_1 = arith.constant 0 : i32
    return %c0_i32, %c0_i32_0 : i32, i32
  }
  func.func @transform_2(%arg0: i32, %arg1: i32) -> (i32, i32) {
    %c0_i32 = arith.constant 0 : i32
    %c0_i32_0 = arith.constant 0 : i32
    %c0_i32_1 = arith.constant 0 : i32
    return %c0_i32, %c0_i32_0 : i32, i32
  }
  func.func @transform_3(%arg0: i32, %arg1: i32) -> (i32, i32, i32) {
    %c0_i32 = arith.constant 0 : i32
    %c0_i32_0 = arith.constant 0 : i32
    return %arg0, %c0_i32, %arg1 : i32, i32, i32
  }
}

</mosaic_0001>

<bundles_post_ra>
// kernel: tpu_custom_call.1
= control target key start
LH: loop header
LB: loop body
LE: loop exit
PB: predicated region body
PF: predicated region fallthrough
CT: control target
= control target key end

     0   :  { %8 = vsyncpa [#allocation3], 0  ;;  %s1255_s0 = inlined_call_operand.hbm [shape: f32[2,8,16], index: 0, kind: input, shape index: {}]   ;;  %s1256_s1 = inlined_call_operand.vmem [shape: f32[2,4,8], index: 1, kind: input, shape index: {}]   ;;  %s1257_s2 = inlined_call_operand.vmem [shape: f32[4,1], index: 2, kind: input, shape index: {}]   ;;  %s1258_s3 = inlined_call_operand.hbm [shape: f32[2,4,32], index: 3, kind: output, shape index: {}]  }
   0x1   :  { %10 = vsyncpa [#allocation3 + $0x1], 0 }
   0x2   :  { %11 = vsyncpa [#allocation4], 0 }
   0x3   :  { %13 = vsyncpa [#allocation4 + $0x1], 0  ;;  %s1050_s12 = smov 0   ;;  %s1052_s13 = smov 0  }
   0x4   :  { %s1054_s14 = smov 0   ;;  %s1056_s15 = smov 0  }
   0x5   :  { %s1058_s16 = smov 0   ;;  %s1060_s17 = smov 0  }
   0x6 LB: > { %s780_s18 = sadd.s32 4294967295, %s1006_s17   ;;  %s781_s19 = sadd.s32 4294967294, %s1006_s17   ;;  %s1006_s17 = sphi %s1060_s17, %s19_s17   ;;  %s1002_s16 = sphi %s1058_s16, %s1274_s16   ;;  %s998_s15 = sphi %s1056_s15, %s1273_s15   ;;  %s994_s14 = sphi %s1054_s14, %s1272_s14   ;;  %s990_s13 = sphi %s1052_s13, %s1271_s13   ;;  %s986_s12 = sphi %s1050_s12, %s1270_s12  }
   0x7   : > { %s31_s20 = sadd.s32 1, %s1002_s16  ;;  %s40_s21 = sadd.s32 1, %s994_s14 }
   0x8   : > { %p33_p0 = scmp.ge.s32.totalorder %s31_s20, 2  ;;  %p47_p1 = scmp.ne.s32.totalorder %s994_s14, %s990_s13 }
   0x9   : > { %p48_p2 = scmp.eq.s32.totalorder %s1006_s17, 0  ;;  %p53_p3 = scmp.ne.s32.totalorder %s990_s13, %s986_s12 }
   0xa   : > { %s1276_s20 = smov (%p33_p0, %s31_s20), 0  ;;  %p54_p5 = scmp.eq.s32.totalorder %s780_s18, 0 }
   0xb   : > { %p1091_p4 = por %p48_p2, %p47_p1  ;;  %s35_s23 = ssub.s32 %s1002_s16, %s1276_s20 }
   0xc   : > { %p121_p6 = scmp.eq.s32.totalorder %s780_s18, 1  ;;  %p38_p7 = scmp.eq.s32.totalorder %s35_s23, 0 }
   0xd   : > { %p1097_p8 = por %p54_p5, %p53_p3  ;;  %p127_p10 = scmp.eq.s32.totalorder %s781_s19, 1 }
   0xe   : > { %p1101_p9 = por %p121_p6, %p47_p1  ;;  %p822_p13 = scmp.lt.s32.totalorder %s1006_s17, 2 }
   0xf   : > { %s1106_s26 = scalar_select %p38_p7, %s994_s14, %s40_s21  }
  0x10   : > { %s1262_s25 = scalar_select %p1101_p9, 1, 0 }
  0x11   : > { %p1108_p11 = por %p127_p10, %p53_p3  ;;  %s153_s28 = sand.u32 1, %s994_s14  }
  0x12   : > { %s784_s29 = sshll.u32 %s153_s28, 3  ;;  %s785_s30 = sshll.u32 %s1002_s16, 7 }
  0x13   : > { %s1263_s27 = scalar_select %p1108_p11, 1, 0 }
  0x14   : > { %s1119_s6 = scalar_lea.hbm %s1255_s0, %s785_s30  ;;  %s157_s7 = scalar_lea.vmem [#allocation2], %s784_s29 }
  0x15   : > { %s165_s8 = sshll.u32 %s157_s7, 4  ;;  %p1125_p0 = pnand %p822_p13, %p1091_p4  ;;  %s1121_s8 = int_to_ptr.vmem [resolvable:$true] %s165_s8 }
  0x16   : > { %s154_s10 = scalar_lea.sflag [#allocation3], %s153_s28  ;;  %s894_s11 = scalar_lea.hbm %s1119_s6, 128 }
  0x17   : > { %p895_p3 = scmp.ne.s32.totalorder %s1119_s6, %s894_s11  ;;  %p896_p5 = pneg %p1125_p0 }
  0x18   : > { %s899_s21 = scalar_lea.hbm %s1255_s0, 256  ;;  %p900_p4 = scmp.lt.u32.totalorder %s1119_s6, %s1255_s0 }
  0x19   : > { %p897_p6 = pnand %p896_p5, %p895_p3  ;;  %p901_p10 = scmp.lt.u32.totalorder %s899_s21, %s894_s11 }
  0x1a   : > { %p903_p12 = scmp.lt.u32.totalorder %s894_s11, %s1119_s6 }
  0x1b   : > { %p898_p7 = pneg %p897_p6  ;;  %p902_p13 = por %p901_p10, %p900_p4 }
  0x1d   : > { %p904_p1 = por %p903_p12, %p902_p13 }
  0x1f   : > { %p905_p2 = pnand %p904_p1, %p898_p7 }
  0x21   : > { %908 = shalt.err (!%p905_p2)
}
  0x22   : > { %s909_s28 = scalar_lea.vmem %s1121_s8, 128  ;;  %s1008_s29 = smov [#allocation2]  }
  0x23   : > { %p910_p3 = scmp.ne.s32.totalorder %s1121_s8, %s909_s28  ;;  %s914_s30 = sshll.u32 %s1008_s29, 4  ;;  %s915_s30 = int_to_ptr.vmem [resolvable:$false] %s914_s30 }
  0x24   : > { %s916_s4 = scalar_lea.vmem %s915_s30, 256  ;;  %p917_p9 = scmp.lt.s32.totalorder %s1121_s8, %s915_s30 }
  0x25   : > { %p912_p6 = pnand %p910_p3, %p896_p5  ;;  %p918_p4 = scmp.lt.s32.totalorder %s916_s4, %s909_s28 }
  0x27   : > { %p913_p11 = pneg %p912_p6  ;;  %p919_p10 = por %p918_p4, %p917_p9 }
  0x29   : > { %p920_p12 = pnand %p919_p10, %p913_p11 }
  0x2b   : > { %923 = shalt.err (!%p920_p12)
}
  0x2c   : > { %817 = dma.hbm_to_vmem [thread:$0]  (!%p1125_p0), %s1119_s6, 128, %s1121_s8, %s154_s10  }
  0x2d   : > { %p1265_p1 = scmp.lt.s32.totalorder %s1006_s17, 3  ;;  %p1266_p2 = scmp.ge.s32.totalorder %s1006_s17, 1 }
  0x2f   : > { %p171_p5 = pnand %p1266_p2, %p1265_p1 }
  0x30   : > { %s1161_s5 = sand.u32 (!%p171_p5), 1, %s990_s13  }
  0x31   : > { %174 = sbr.rel (%p171_p5) target bundleno = 588 (0x24c), region = 32  ;;  %s787_s7 = sshll.u32 (!%p171_p5), %s1161_s5, 3 }
  0x32   : > { %s177_s11 = scalar_lea.sflag (!%p171_p5), [#allocation3], %s1161_s5  ;;  %s180_s18 = scalar_lea.vmem (!%p171_p5), [#allocation2], %s787_s7 }
  0x38   : > { %977 = dma.done.wait (%p1097_p8), %s177_s11, 128  }
  0x39   : > { %979 = vsyncadd (%p1097_p8), %s177_s11, 4294967168  ;;  %v1009_v0 = vmov 0.0   ;;  %vm1010_vm0 = vmmov 0   ;;  %vm205_vm1 = vcmask 64512   ;;  %v203_v1 = vld [vmem:[%s180_s18] sm:$0xff]  ;;  %v354_v4 = vlaneseq  ;;  %s1014_s21 = smov 4  }
  0x3a   : > { %800 = vmatprep.subr.mxu0 %v1009_v0  ;;  %802 = vmatprep.mubr.msk.f32.mxu0 %vm1010_vm0, %v1009_v0  ;;  %v204_v2 = vld [vmem:[%s1256_s1] sm:$0xf]  ;;  %v790_v3 = vld [vmem:[%s1256_s1 + $0x4] sm:$0xf]  ;;  %v1011_v5 = vmov 0   ;;  %vm442_vm2 = vcmask 7168  }
  0x3b   : > { %805 = vmatprep.subr.mxu1 %v1009_v0  ;;  %807 = vmatprep.mubr.msk.f32.mxu1 %vm1010_vm0, %v1009_v0  ;;  %v355_v6 = vshrl.u32 %v354_v4, 7  ;;  %v676_v23 = vld [vmem:[%s1257_s2] sm:$0xf]  ;;  %v1012_v28 = vmov 1983009808   ;;  %s1015_s22 = smov 8  }
  0x3c   : > { %801 = vmatpush3.msra.mxu0 %v203_v1  ;;  %806 = vmatpush3.msra.mxu1 %v203_v1  ;;  %v454_v29 = vunpack.c.l.s4 %v1012_v28  ;;  %v1013_v30 = vmov 1934713408   ;;  %s1016_s23 = smov 12   ;;  %s1017_s28 = smov 20   ;;  %vm647_vm3 = vcmask 15360   ;;  %vm649_vm4 = vcmask 31744  }
  0x3d   : > { %803 = vmatmul.mubr.msk.f32.vlgmr.msra.gmra.mrb[0].mxu0 %vm205_vm1, %v204_v2  ;;  %808 = vmatmul.mubr.msk.f32.vlgmr.msra.gmra.mrb[0].mxu1 %vm205_vm1, %v790_v3  ;;  %v378_v7 = vsub.s32 2, %v355_v6  ;;  %v356_v8 = vsub.s32 0, %v355_v6  ;;  %v389_v14 = vsub.s32 3, %v355_v6  ;;  %v367_v15 = vsub.s32 1, %v355_v6  ;;  %s1018_s29 = smov 16   ;;  %s1019_s30 = smov 2  }
  0x3e   : > { %892 = vset.pattern.permute.xlu1 %v1011_v5  ;;  %893 = vset.pattern.permute.xlu0 %v1011_v5  ;;  %v486_v31 = vunpack.c.l.s4 %v1013_v30  ;;  %v455_v34 = vunpack.c.0.s8 %v454_v29  ;;  %s1020_s4 = smov 22   ;;  %s1021_s7 = smov 6   ;;  %vm651_vm5 = vcmask 48128   ;;  %vm654_vm6 = vcmask 80896  }
  0x3f   : > { %s1022_s11 = smov 26   ;;  %s1023_s18 = smov 10   ;;  %vm656_vm7 = vcmask 97280   ;;  %vm658_vm8 = vcmask 113664   ;;  %vm660_vm9 = vcmask 130048   ;;  %vm662_vm10 = vcmask 146432  }
  0x40   : > { %v487_v35 = vunpack.c.0.s8 %v486_v31  ;;  %v458_v36 = vsub.s32 %v455_v34, %v355_v6  ;;  %s1024_s6 = smov 30   ;;  %s1025_s8 = smov 14   ;;  %vm664_vm11 = vcmask 162816   ;;  %vm666_vm12 = vcmask 179200  }
  0x41   : > { %s1026_s9 = smov 18   ;;  %s1027_s10 = smov 24   ;;  %vm668_vm13 = vcmask 195584   ;;  %vm670_vm14 = vcmask 211968   ;;  %vm672_vm15 = vcmask 228352   ;;  %vm674_vm0 = vcmask 244736  }
  0x42   : > { %v490_v47 = vsub.s32 %v487_v35, %v355_v6  ;;  %s1028_s24 = smov 28   ;;  %s788_s19 = sshll.u32 %s1161_s5, 2 }
  0x43   : > { %p1267_p9 = scmp.ne.s32.totalorder %s1262_s25, 0 }
 0x110   : > { %v275_v9 = vpop.f32.mrb[0].mxu0  ;;  %v350_v10 = vpop.f32.mrb[0].mxu1 }
 0x111   : > { %v804_v11 = vpop.f32.mrb[1].mxu0  ;;  %v379_v12 = vrot.slane %v275_v9, %v378_v7  ;;  %v357_v13 = vrot.slane %v275_v9, %v356_v8  ;;  %v809_v16 = vpop.f32.mrb[1].mxu1  ;;  %v390_v17 = vrot.slane %v275_v9, %v389_v14  ;;  %v368_v18 = vrot.slane %v275_v9, %v367_v15 }
 0x112   : > { %v412_v19 = vrot.slane %v350_v10, %v367_v15  ;;  %v401_v20 = vrot.slane %v350_v10, %v356_v8  ;;  %v434_v21 = vrot.slane %v350_v10, %v389_v14  ;;  %v423_v22 = vrot.slane %v350_v10, %v378_v7 }
 0x113   : > { %381 = vbcast.lane.b32.xlu1 %v379_v12, 256  ;;  %359 = vbcast.lane.b32.xlu0 %v357_v13, 256 }
 0x117   : > { %392 = vbcast.lane.b32.xlu1 %v390_v17, 256  ;;  %370 = vbcast.lane.b32.xlu0 %v368_v18, 256 }
 0x11b   : > { %414 = vbcast.lane.b32.xlu1 %v412_v19, 256  ;;  %403 = vbcast.lane.b32.xlu0 %v401_v20, 256 }
 0x11f   : > { %436 = vbcast.lane.b32.xlu1 %v434_v21, 256  ;;  %425 = vbcast.lane.b32.xlu0 %v423_v22, 256 }
 0x123   : > { %374 = vbcast.lane.b32.xlu1 %v368_v18, 264  ;;  %363 = vbcast.lane.b32.xlu0 %v357_v13, 264 }
 0x127   : > { %396 = vbcast.lane.b32.xlu1 %v390_v17, 264  ;;  %385 = vbcast.lane.b32.xlu0 %v379_v12, 264 }
 0x12b   : > { %418 = vbcast.lane.b32.xlu1 %v412_v19, 264  ;;  %407 = vbcast.lane.b32.xlu0 %v401_v20, 264 }
 0x12f   : > { %440 = vbcast.lane.b32.xlu1 %v434_v21, 264  ;;  %429 = vbcast.lane.b32.xlu0 %v423_v22, 264 }
 0x133   : > { %679 = vperm.xlu1 %892, %v676_v23  }
 0x185   : > { %v382_v24 = vpop.permute.xlu1 %381  ;;  %v360_v25 = vpop.permute.xlu0 %359 }
 0x189   : > { %v393_v26 = vpop.permute.xlu1 %392  ;;  %v371_v27 = vpop.permute.xlu0 %370 }
 0x18d   : > { %v415_v32 = vpop.permute.xlu1 %414  ;;  %v404_v33 = vpop.permute.xlu0 %403 }
 0x18e   : > { %v445_v39 = vsel %vm442_vm2, %v371_v27, %v415_v32  ;;  %v443_v40 = vsel %vm442_vm2, %v360_v25, %v404_v33 }
 0x191   : > { %v437_v37 = vpop.permute.xlu1 %436  ;;  %v426_v38 = vpop.permute.xlu0 %425 }
 0x192   : > { %v449_v41 = vsel %vm442_vm2, %v393_v26, %v437_v37  ;;  %v447_v42 = vsel %vm442_vm2, %v382_v24, %v426_v38 }
 0x193   : > { %v467_v43 = vcombine.low %v445_v39, %v449_v41  ;;  %v468_v44 = vcombine.high %v445_v39, %v449_v41  ;;  %v451_v45 = vcombine.low %v443_v40, %v447_v42  ;;  %v452_v46 = vcombine.high %v443_v40, %v447_v42 }
 0x195   : > { %v475_v48 = vrot.slane %v467_v43, %v458_v36  ;;  %v482_v49 = vrot.slane %v468_v44, %v458_v36  ;;  %v459_v50 = vrot.slane %v451_v45, %v458_v36  ;;  %v466_v51 = vrot.slane %v452_v46, %v458_v36  ;;  %v375_v52 = vpop.permute.xlu1 %374  ;;  %v364_v53 = vpop.permute.xlu0 %363 }
 0x197   : > { %v484_v54 = vcombine.high %v459_v50, %v475_v48  ;;  %v499_v58 = vcombine.low %v466_v51, %v482_v49  ;;  %v500_v62 = vcombine.high %v466_v51, %v482_v49  ;;  %v483_v11 = vcombine.low %v459_v50, %v475_v48 }
 0x199   : > { %v397_v55 = vpop.permute.xlu1 %396  ;;  %v386_v56 = vpop.permute.xlu0 %385  ;;  %v498_v57 = vrot.slane %v484_v54, %v490_v47  ;;  %v507_v61 = vrot.slane %v499_v58, %v490_v47  ;;  %v514_v2 = vrot.slane %v500_v62, %v490_v47  ;;  %v491_v21 = vrot.slane %v483_v11, %v490_v47 }
 0x19b   : > { %592 = vrot.lane.b32.xlu1 %v498_v57, %s1014_s21  ;;  %v515_v23 = vcombine.high %v491_v21, %v1009_v0  ;;  %v516_v26 = vcombine.high %v498_v57, %v1009_v0  ;;  %v517_v29 = vcombine.high %v507_v61, %v1009_v0  ;;  %v518_v31 = vcombine.high %v514_v2, %v1009_v0  ;;  %s793_s21 = sshll.u32 %s998_s15, 6 }
 0x19d   : > { %v419_v59 = vpop.permute.xlu1 %418  ;;  %v408_v60 = vpop.permute.xlu0 %407 }
 0x19e   : > { %v446_v3 = vsel %vm442_vm2, %v375_v52, %v419_v59  ;;  %v444_v4 = vsel %vm442_vm2, %v364_v53, %v408_v60 }
 0x19f   : > { %600 = vrot.lane.b32.xlu1 %v507_v61, %s1015_s22  ;;  %s202_s22 = scalar_lea.vmem [#allocation5], %s788_s19 }
 0x1a1   : > { %v441_v63 = vpop.permute.xlu1 %440  ;;  %v430_v1 = vpop.permute.xlu0 %429 }
 0x1a2   : > { %v450_v5 = vsel %vm442_vm2, %v397_v55, %v441_v63  ;;  %v448_v6 = vsel %vm442_vm2, %v386_v56, %v430_v1 }
 0x1a3   : > { %v535_v7 = vcombine.low %v446_v3, %v450_v5  ;;  %v536_v8 = vcombine.high %v446_v3, %v450_v5  ;;  %v519_v9 = vcombine.low %v444_v4, %v448_v6  ;;  %v520_v10 = vcombine.high %v444_v4, %v448_v6  ;;  %608 = vrot.lane.b32.xlu1 %v514_v2, %s1016_s23  ;;  %s700_s23 = sshll.u32 %s202_s22, 4  ;;  %s1208_s23 = int_to_ptr.vmem [resolvable:$true] %s700_s23 }
 0x1a4   : > { %s924_s15 = scalar_lea.vmem %s1208_s23, 64 }
 0x1a5   : > { %v543_v12 = vrot.slane %v535_v7, %v458_v36  ;;  %v550_v13 = vrot.slane %v536_v8, %v458_v36  ;;  %v527_v14 = vrot.slane %v519_v9, %v458_v36  ;;  %v534_v15 = vrot.slane %v520_v10, %v458_v36  ;;  %p925_p8 = scmp.ne.s32.totalorder %s1208_s23, %s924_s15 }
 0x1a7   : > { %v552_v16 = vcombine.high %v527_v14, %v543_v12  ;;  %v551_v17 = vcombine.low %v527_v14, %v543_v12  ;;  %v567_v18 = vcombine.low %v534_v15, %v550_v13  ;;  %v568_v22 = vcombine.high %v534_v15, %v550_v13  ;;  %p926_p11 = pnand %p925_p8, %p1267_p9 }
 0x1a9   : > { %v566_v19 = vrot.slane %v552_v16, %v490_v47  ;;  %v559_v20 = vrot.slane %v551_v17, %v490_v47  ;;  %v575_v25 = vrot.slane %v567_v18, %v490_v47  ;;  %v582_v28 = vrot.slane %v568_v22, %v490_v47  ;;  %p927_p0 = pneg %p926_p11 }
 0x1ab   : > { %624 = vrot.lane.b32.xlu0 %v566_v19, %s1017_s28  ;;  %616 = vrot.lane.b32.xlu1 %v559_v20, %s1018_s29  ;;  %v584_v24 = vcombine.high %v566_v19, %v1009_v0  ;;  %v585_v27 = vcombine.high %v575_v25, %v1009_v0  ;;  %v586_v30 = vcombine.high %v582_v28, %v1009_v0 }
 0x1ac   : > { %v583_v32 = vcombine.high %v559_v20, %v1009_v0 }
 0x1af   : > { %588 = vrot.lane.b32.xlu0 %v515_v23, %s1019_s30  ;;  %628 = vrot.lane.b32.xlu1 %v584_v24, %s1020_s4  ;;  %s1206_s30 = scalar_lea.hbm %s1258_s3, %s793_s21  ;;  %s686_s4 = scalar_lea.sflag [#allocation4], %s1161_s5 }
 0x1b2   : > { %v680_v33 = vpop.permute.xlu1 %679 }
 0x1b3   : > { %596 = vrot.lane.b32.xlu0 %v516_v26, %s1021_s7  ;;  %636 = vrot.lane.b32.xlu1 %v585_v27, %s1022_s11  ;;  %s1029_s7 = smov [#allocation5]  }
 0x1b4   : > { %s928_s11 = sshll.u32 %s1029_s7, 4  ;;  %s929_s11 = int_to_ptr.vmem [resolvable:$false] %s928_s11 }
 0x1b5   : > { %p931_p7 = scmp.lt.s32.totalorder %s1208_s23, %s929_s11 }
 0x1b7   : > { %604 = vrot.lane.b32.xlu0 %v517_v29, %s1023_s18  ;;  %644 = vrot.lane.b32.xlu1 %v586_v30, %s1024_s6  ;;  %s930_s18 = scalar_lea.vmem %s929_s11, 128 }
 0x1b8   : > { %p932_p13 = scmp.lt.s32.totalorder %s930_s18, %s924_s15 }
 0x1ba   : > { %p933_p3 = por %p932_p13, %p931_p7 }
 0x1bb   : > { %612 = vrot.lane.b32.xlu0 %v518_v31, %s1025_s8 }
 0x1bc   : > { %p934_p6 = pnand %p933_p3, %p927_p0 }
 0x1bf   : > { %620 = vrot.lane.b32.xlu0 %v583_v32, %s1026_s9 }
 0x1c3   : > { %632 = vrot.lane.b32.xlu0 %v575_v25, %s1027_s10 }
 0x1c7   : > { %640 = vrot.lane.b32.xlu0 %v582_v28, %s1028_s24 }
 0x20d   : > { %v593_v34 = vpop.permute.xlu1 %592 }
 0x211   : > { %v601_v36 = vpop.permute.xlu1 %600 }
 0x215   : > { %v609_v39 = vpop.permute.xlu1 %608 }
 0x21d   : > { %v625_v35 = vpop.permute.xlu0 %624  ;;  %v617_v0 = vpop.permute.xlu1 %616 }
 0x221   : > { %v589_v37 = vpop.permute.xlu0 %588  ;;  %v629_v48 = vpop.permute.xlu1 %628 }
 0x222   : > { %v648_v38 = vsel %vm647_vm3, %v491_v21, %v589_v37 }
 0x223   : > { %v650_v40 = vsel %vm649_vm4, %v648_v38, %v593_v34 }
 0x225   : > { %v597_v41 = vpop.permute.xlu0 %596  ;;  %v637_v54 = vpop.permute.xlu1 %636 }
 0x226   : > { %v652_v42 = vsel %vm651_vm5, %v650_v40, %v597_v41 }
 0x227   : > { %v653_v43 = vsel %vm205_vm1, %v652_v42, %v601_v36  ;;  %vm683_vm1 = vcmask 257024  }
 0x229   : > { %v605_v44 = vpop.permute.xlu0 %604  ;;  %v645_v60 = vpop.permute.xlu1 %644 }
 0x22a   : > { %v655_v45 = vsel %vm654_vm6, %v653_v43, %v605_v44 }
 0x22b   : > { %v657_v46 = vsel %vm656_vm7, %v655_v45, %v609_v39 }
 0x22d   : > { %v613_v47 = vpop.permute.xlu0 %612 }
 0x22e   : > { %v659_v49 = vsel %vm658_vm8, %v657_v46, %v613_v47 }
 0x22f   : > { %v661_v50 = vsel %vm660_vm9, %v659_v49, %v617_v0 }
 0x231   : > { %v621_v51 = vpop.permute.xlu0 %620 }
 0x232   : > { %v663_v52 = vsel %vm662_vm10, %v661_v50, %v621_v51 }
 0x233   : > { %v665_v53 = vsel %vm664_vm11, %v663_v52, %v625_v35 }
 0x234   : > { %v667_v55 = vsel %vm666_vm12, %v665_v53, %v629_v48 }
 0x235   : > { %v633_v56 = vpop.permute.xlu0 %632 }
 0x236   : > { %v669_v57 = vsel %vm668_vm13, %v667_v55, %v633_v56 }
 0x237   : > { %v671_v58 = vsel %vm670_vm14, %v669_v57, %v637_v54 }
 0x239   : > { %v641_v59 = vpop.permute.xlu0 %640 }
 0x23a   : > { %v673_v61 = vsel %vm672_vm15, %v671_v58, %v641_v59 }
 0x23b   : > { %v675_v62 = vsel %vm674_vm0, %v673_v61, %v645_v60 }
 0x23c   : > { %v682_v63 = vadd.f32 %v680_v33, %v675_v62 }
 0x23e   : > { %684 = vst.msk [vmem:[%s202_s22] sm:$0xf] %vm683_vm1, %v682_v63 }
 0x23f   : > { %937 = shalt.err (!%p934_p6)
}
 0x240   : > { %s938_s5 = scalar_lea.hbm %s1206_s30, 64  ;;  %s942_s9 = scalar_lea.hbm %s1258_s3, 128 }
 0x241   : > { %p939_p4 = scmp.ne.s32.totalorder %s1206_s30, %s938_s5  ;;  %p943_p1 = scmp.lt.u32.totalorder %s1206_s30, %s1258_s3 }
 0x242   : > { %p944_p2 = scmp.lt.u32.totalorder %s942_s9, %s938_s5  ;;  %p946_p8 = scmp.lt.u32.totalorder %s938_s5, %s1206_s30 }
 0x243   : > { %p940_p10 = pnand %p939_p4, %p1267_p9 }
 0x244   : > { %p945_p5 = por %p944_p2, %p943_p1 }
 0x245   : > { %p941_p12 = pneg %p940_p10 }
 0x246   : > { %p947_p11 = por %p946_p8, %p945_p5 }
 0x248   : > { %p948_p0 = pnand %p947_p11, %p941_p12 }
 0x24a   : > { %951 = shalt.err (!%p948_p0)
}
 0x24b   : > { %812 = dma.vmem_to_hbm [thread:$0]  (%p1267_p9), %s1208_s23, 64, %s1206_s30, %s686_s4  }
 0x24c PF: > { %s712_s19 = sand.u32 1, %s986_s12   ;;  %p1268_p7 = scmp.ne.s32.totalorder %s1263_s27, 0 }
 0x24d   : > { %p1269_p13 = scmp.ge.s32.totalorder %s1006_s17, 2  ;;  %s713_s21 = scalar_lea.sflag [#allocation4], %s712_s19 }
 0x24f   : > { %p819_p3 = pnand %p1269_p13, %p1268_p7 }
 0x251   : > { %981 = dma.done.wait (!%p819_p3), %s713_s21, 64  }
 0x252   : > { %983 = vsyncadd (!%p819_p3), %s713_s21, 4294967232  ;;  %s19_s17 = sadd.s32 1, %s1006_s17   ;;  %s1270_s12 = smov %s990_s13 }
 0x253   : > { %p16_p6 = scmp.ge.s32.totalorder %s19_s17, 4   ;;  %s1271_s13 = smov %s994_s14 }
 0x254   : > { %s1272_s14 = smov %s1106_s26  ;;  %s1273_s15 = smov %s1002_s16 }
 0x255   : > { %s1274_s16 = smov %s1276_s20  ;;  %18 = sbr.rel (!%p16_p6) target bundleno = 6 (0x6), region = 78 }
 0x25c   :  { %718 = vsyncpa [#allocation3], 1 }
 0x25d   :  { %720 = vsyncpa [#allocation3 + $0x1], 1 }
 0x25e   :  { %721 = vsyncpa [#allocation4], 1 }
 0x25f   :  { %723 = vsyncpa [#allocation4 + $0x1], 1 }

// kernel: tpu_custom_call.1
= control target key start
LH: loop header
LB: loop body
LE: loop exit
PB: predicated region body
PF: predicated region fallthrough
CT: control target
= control target key end

     0   :  { %8 = vsyncpa [#allocation3], 0  ;;  %s786_s0 = inlined_call_operand.hbm [shape: f32[2,8,16], index: 0, kind: input, shape index: {}]   ;;  %s787_s1 = inlined_call_operand.vmem [shape: f32[8,8], index: 1, kind: input, shape index: {}]   ;;  %s788_s2 = inlined_call_operand.vmem [shape: f32[8,1], index: 2, kind: input, shape index: {}]   ;;  %s789_s3 = inlined_call_operand.hbm [shape: f32[2,8,16], index: 3, kind: output, shape index: {}]  }
   0x1   :  { %10 = vsyncpa [#allocation3 + $0x1], 0 }
   0x2   :  { %11 = vsyncpa [#allocation4], 0 }
   0x3   :  { %13 = vsyncpa [#allocation4 + $0x1], 0  ;;  %s608_s12 = smov 0   ;;  %s610_s13 = smov 0  }
   0x4   :  { %s612_s14 = smov 0   ;;  %s614_s15 = smov 0  }
   0x5   :  { %s616_s16 = smov 0   ;;  %s618_s17 = smov 0  }
   0x6 LB: > { %s382_s18 = sadd.s32 4294967295, %s581_s17   ;;  %s383_s19 = sadd.s32 4294967294, %s581_s17   ;;  %s581_s17 = sphi %s618_s17, %s19_s17   ;;  %s577_s16 = sphi %s616_s16, %s805_s16   ;;  %s573_s15 = sphi %s614_s15, %s804_s15   ;;  %s569_s14 = sphi %s612_s14, %s803_s14   ;;  %s565_s13 = sphi %s610_s13, %s802_s13   ;;  %s561_s12 = sphi %s608_s12, %s801_s12  }
   0x7   : > { %s31_s20 = sadd.s32 1, %s577_s16  ;;  %s40_s21 = sadd.s32 1, %s569_s14 }
   0x8   : > { %p33_p0 = scmp.ge.s32.totalorder %s31_s20, 2  ;;  %p47_p1 = scmp.ne.s32.totalorder %s569_s14, %s565_s13 }
   0x9   : > { %p48_p2 = scmp.eq.s32.totalorder %s581_s17, 0  ;;  %p53_p3 = scmp.ne.s32.totalorder %s565_s13, %s561_s12 }
   0xa   : > { %s807_s20 = smov (%p33_p0, %s31_s20), 0  ;;  %p54_p5 = scmp.eq.s32.totalorder %s382_s18, 0 }
   0xb   : > { %p649_p4 = por %p48_p2, %p47_p1  ;;  %s35_s23 = ssub.s32 %s577_s16, %s807_s20 }
   0xc   : > { %p121_p6 = scmp.eq.s32.totalorder %s382_s18, 1  ;;  %p38_p7 = scmp.eq.s32.totalorder %s35_s23, 0 }
   0xd   : > { %p655_p8 = por %p54_p5, %p53_p3  ;;  %p127_p10 = scmp.eq.s32.totalorder %s383_s19, 1 }
   0xe   : > { %p659_p9 = por %p121_p6, %p47_p1  ;;  %p415_p13 = scmp.lt.s32.totalorder %s581_s17, 2 }
   0xf   : > { %s664_s26 = scalar_select %p38_p7, %s569_s14, %s40_s21  }
  0x10   : > { %s793_s25 = scalar_select %p659_p9, 1, 0 }
  0x11   : > { %p666_p11 = por %p127_p10, %p53_p3  ;;  %s153_s28 = sand.u32 1, %s569_s14  }
  0x12   : > { %s386_s29 = sshll.u32 %s153_s28, 3  ;;  %s387_s30 = sshll.u32 %s577_s16, 7 }
  0x13   : > { %s794_s27 = scalar_select %p666_p11, 1, 0 }
  0x14   : > { %s677_s6 = scalar_lea.hbm %s786_s0, %s387_s30  ;;  %s157_s7 = scalar_lea.vmem [#allocation2], %s386_s29 }
  0x15   : > { %s165_s8 = sshll.u32 %s157_s7, 4  ;;  %p683_p0 = pnand %p415_p13, %p649_p4  ;;  %s679_s8 = int_to_ptr.vmem [resolvable:$true] %s165_s8 }
  0x16   : > { %s154_s10 = scalar_lea.sflag [#allocation3], %s153_s28  ;;  %s469_s11 = scalar_lea.hbm %s677_s6, 128 }
  0x17   : > { %p470_p3 = scmp.ne.s32.totalorder %s677_s6, %s469_s11  ;;  %p471_p5 = pneg %p683_p0 }
  0x18   : > { %s474_s21 = scalar_lea.hbm %s786_s0, 256  ;;  %p475_p4 = scmp.lt.u32.totalorder %s677_s6, %s786_s0 }
  0x19   : > { %p472_p6 = pnand %p471_p5, %p470_p3  ;;  %p476_p10 = scmp.lt.u32.totalorder %s474_s21, %s469_s11 }
  0x1a   : > { %p478_p12 = scmp.lt.u32.totalorder %s469_s11, %s677_s6 }
  0x1b   : > { %p473_p7 = pneg %p472_p6  ;;  %p477_p13 = por %p476_p10, %p475_p4 }
  0x1d   : > { %p479_p1 = por %p478_p12, %p477_p13 }
  0x1f   : > { %p480_p2 = pnand %p479_p1, %p473_p7 }
  0x21   : > { %483 = shalt.err (!%p480_p2)
}
  0x22   : > { %s484_s28 = scalar_lea.vmem %s679_s8, 128  ;;  %s583_s29 = smov [#allocation2]  }
  0x23   : > { %p485_p3 = scmp.ne.s32.totalorder %s679_s8, %s484_s28  ;;  %s489_s30 = sshll.u32 %s583_s29, 4  ;;  %s490_s30 = int_to_ptr.vmem [resolvable:$false] %s489_s30 }
  0x24   : > { %s491_s4 = scalar_lea.vmem %s490_s30, 256  ;;  %p492_p9 = scmp.lt.s32.totalorder %s679_s8, %s490_s30 }
  0x25   : > { %p487_p6 = pnand %p485_p3, %p471_p5  ;;  %p493_p4 = scmp.lt.s32.totalorder %s491_s4, %s484_s28 }
  0x27   : > { %p488_p11 = pneg %p487_p6  ;;  %p494_p10 = por %p493_p4, %p492_p9 }
  0x29   : > { %p495_p12 = pnand %p494_p10, %p488_p11 }
  0x2b   : > { %498 = shalt.err (!%p495_p12)
}
  0x2c   : > { %410 = dma.hbm_to_vmem [thread:$0]  (!%p683_p0), %s677_s6, 128, %s679_s8, %s154_s10  }
  0x2d   : > { %p796_p1 = scmp.lt.s32.totalorder %s581_s17, 3  ;;  %p797_p2 = scmp.ge.s32.totalorder %s581_s17, 1 }
  0x2f   : > { %p171_p5 = pnand %p797_p2, %p796_p1 }
  0x30   : > { %s719_s5 = sand.u32 (!%p171_p5), 1, %s565_s13  }
  0x31   : > { %174 = sbr.rel (%p171_p5) target bundleno = 288 (0x120), region = 32  ;;  %s389_s7 = sshll.u32 (!%p171_p5), %s719_s5, 3 }
  0x32   : > { %s177_s11 = scalar_lea.sflag (!%p171_p5), [#allocation3], %s719_s5  ;;  %s180_s18 = scalar_lea.vmem (!%p171_p5), [#allocation2], %s389_s7 }
  0x38   : > { %552 = dma.done.wait (%p655_p8), %s177_s11, 128  }
  0x39   : > { %554 = vsyncadd (%p655_p8), %s177_s11, 4294967168  ;;  %v584_v0 = vmov 0.0   ;;  %vm585_vm0 = vmmov 0   ;;  %v586_v1 = vmov 0   ;;  %vm211_vm1 = vcmask 64512   ;;  %v204_v2 = vld [vmem:[%s180_s18] sm:$0xff] }
  0x3a   : > { %398 = vmatprep.subr.mxu0 %v584_v0  ;;  %400 = vmatprep.mubr.msk.f32.mxu0 %vm585_vm0, %v584_v0  ;;  %v203_v3 = vld [vmem:[%s787_s1] sm:$0xff]  ;;  %s393_s24 = sshll.u32 %s573_s15, 7  ;;  %s202_s19 = scalar_lea.vmem [#allocation5], %s389_s7  ;;  %vm285_vm2 = vcmask 130048  }
  0x3b   : > { %468 = vset.pattern.permute.xlu0 %v586_v1  ;;  %v205_v4 = vld [vmem:[%s788_s2] sm:$0xff]  ;;  %399 = vmatpush3.msra.mxu0 %v204_v2  ;;  %s302_s21 = sshll.u32 %s202_s19, 4  ;;  %s737_s28 = scalar_lea.hbm %s789_s3, %s393_s24  ;;  %s739_s21 = int_to_ptr.vmem [resolvable:$true] %s302_s21 }
  0x3c   : > { %208 = vperm.xlu0 %468, %v205_v4   ;;  %401 = vmatmul.mubr.msk.f32.vlgmr.msra.gmra.mrb[0].mxu0 %vm211_vm1, %v203_v3  ;;  %s288_s29 = scalar_lea.sflag [#allocation4], %s719_s5  ;;  %s499_s30 = scalar_lea.vmem %s739_s21, 128 }
  0x3d   : > { %p500_p8 = scmp.ne.s32.totalorder %s739_s21, %s499_s30  ;;  %p798_p9 = scmp.ne.s32.totalorder %s793_s25, 0 }
  0x3e   : > { %s587_s15 = smov [#allocation5]  }
  0x3f   : > { %p501_p11 = pnand %p500_p8, %p798_p9  ;;  %s503_s4 = sshll.u32 %s587_s15, 4  ;;  %s504_s4 = int_to_ptr.vmem [resolvable:$false] %s503_s4 }
  0x40   : > { %s505_s7 = scalar_lea.vmem %s504_s4, 256  ;;  %p506_p7 = scmp.lt.s32.totalorder %s739_s21, %s504_s4 }
  0x41   : > { %p502_p0 = pneg %p501_p11  ;;  %p507_p13 = scmp.lt.s32.totalorder %s505_s7, %s499_s30 }
  0x43   : > { %p508_p3 = por %p507_p13, %p506_p7 }
  0x45   : > { %p509_p6 = pnand %p508_p3, %p502_p0 }
  0xbb   : > { %v209_v5 = vpop.permute.xlu0 %208 }
 0x10f   : > { %v281_v6 = vpop.f32.mrb[0].mxu0 }
 0x110   : > { %v282_v7 = vadd.f32 %v281_v6, %v209_v5  ;;  %v402_v8 = vpop.f32.mrb[1].mxu0 }
 0x112   : > { %286 = vst.msk [vmem:[%s202_s19] sm:$0xff] %vm285_vm2, %v282_v7 }
 0x113   : > { %512 = shalt.err (!%p509_p6)
}
 0x114   : > { %s513_s5 = scalar_lea.hbm %s737_s28, 128  ;;  %s517_s6 = scalar_lea.hbm %s789_s3, 256 }
 0x115   : > { %p514_p4 = scmp.ne.s32.totalorder %s737_s28, %s513_s5  ;;  %p518_p1 = scmp.lt.u32.totalorder %s737_s28, %s789_s3 }
 0x116   : > { %p519_p2 = scmp.lt.u32.totalorder %s517_s6, %s513_s5  ;;  %p521_p8 = scmp.lt.u32.totalorder %s513_s5, %s737_s28 }
 0x117   : > { %p515_p10 = pnand %p514_p4, %p798_p9 }
 0x118   : > { %p520_p5 = por %p519_p2, %p518_p1 }
 0x119   : > { %p516_p12 = pneg %p515_p10 }
 0x11a   : > { %p522_p11 = por %p521_p8, %p520_p5 }
 0x11c   : > { %p523_p0 = pnand %p522_p11, %p516_p12 }
 0x11e   : > { %526 = shalt.err (!%p523_p0)
}
 0x11f   : > { %405 = dma.vmem_to_hbm [thread:$0]  (%p798_p9), %s739_s21, 128, %s737_s28, %s288_s29  }
 0x120 PF: > { %s314_s10 = sand.u32 1, %s561_s12   ;;  %p799_p7 = scmp.ne.s32.totalorder %s794_s27, 0 }
 0x121   : > { %p800_p13 = scmp.ge.s32.totalorder %s581_s17, 2  ;;  %s315_s24 = scalar_lea.sflag [#allocation4], %s314_s10 }
 0x123   : > { %p412_p3 = pnand %p800_p13, %p799_p7 }
 0x125   : > { %556 = dma.done.wait (!%p412_p3), %s315_s24, 128  }
 0x126   : > { %558 = vsyncadd (!%p412_p3), %s315_s24, 4294967168  ;;  %s19_s17 = sadd.s32 1, %s581_s17   ;;  %s801_s12 = smov %s565_s13 }
 0x127   : > { %p16_p6 = scmp.ge.s32.totalorder %s19_s17, 4   ;;  %s802_s13 = smov %s569_s14 }
 0x128   : > { %s803_s14 = smov %s664_s26  ;;  %s804_s15 = smov %s577_s16 }
 0x129   : > { %s805_s16 = smov %s807_s20  ;;  %18 = sbr.rel (!%p16_p6) target bundleno = 6 (0x6), region = 77 }
 0x130   :  { %320 = vsyncpa [#allocation3], 1 }
 0x131   :  { %322 = vsyncpa [#allocation3 + $0x1], 1 }
 0x132   :  { %323 = vsyncpa [#allocation4], 1 }
 0x133   :  { %325 = vsyncpa [#allocation4 + $0x1], 1 }

</bundles_post_ra>
